<compile_context>
chip_gen: v7x
topology: tpu7x:2x2x1
jax: 0.10.0
libtpu: 0.0.40
codegen_flags: <defaults>
</compile_context>

<pallas_src>
import math

import jax
import jax.numpy as jnp
from jax.experimental import pallas as pl
from jax.experimental.pallas import tpu as pltpu


def _copy_kernel(x_ref, o_ref):
    # Identity pass over a lane-dense block.  Any fused elementwise compute on
    # the flattened activations would go here (this is the fusion anchor).
    o_ref[...] = x_ref[...]


# Per-block byte budget.  With default double buffering the live VMEM set is
# ~2*(in block) + 2*(out block) = 4 * block  ->  ~16 MiB live for 4 MiB blocks.
_BLOCK_BUDGET_BYTES = 4 * 1024 * 1024
# Explicit scoped-VMEM budget: 32 MiB fits every generation's physical VMEM
# (v5e/v6e 128 MiB, v7x 64 MiB) and lifts v5e's 16 MiB scoped default.
_VMEM_LIMIT_BYTES = 32 * 1024 * 1024


def _sublane_multiple(itemsize: int) -> int:
    # Sub-32-bit dtypes pack along sublanes: f32 -> 8, bf16 -> 16, int8/fp8 -> 32.
    return max(8, 32 // itemsize)


def _plan_slab(n: int, itemsize: int):
    """Lane-dense slab plan (preferred): view the flat buffer as (rows, cols)
    with cols a multiple of 128 and full-width blocks -> contiguous DMA and
    unmasked vst on every block.  Returns None if n is not a 128-multiple."""
    if n % 128 != 0:
        return None
    sub = _sublane_multiple(itemsize)
    budget_elems = _BLOCK_BUDGET_BYTES // itemsize
    # Largest 128-multiple divisor of n such that a `sub`-row band fits budget.
    max_cols = max(128, (budget_elems // sub) // 128 * 128)
    cols = 128
    c = 256
    limit = min(n, max_cols)
    while c <= limit:
        if n % c == 0:
            cols = c
        c += 128
    rows = n // cols

    if rows <= sub:
        bm = rows  # full extent (block == whole slab)
    else:
        bm = max(sub, min(rows, budget_elems // cols) // sub * sub)
        # Keep >= 2 grid points when there is enough data so both v7x
        # TensorCores get a DMA stream on the "parallel" axis.
        if pl.cdiv(rows, bm) < 2 and rows >= 2 * sub:
            bm = max(sub, (rows // 2) // sub * sub)

    grid = (pl.cdiv(rows, bm),)
    return (rows, cols), (bm, cols), grid


def _plan_bf(b: int, f: int, itemsize: int):
    """Fallback plan: tile the logical (B, F) view directly (only used when
    B*F is not a multiple of 128).  Prefer full-width rows to avoid masked
    column-edge stores; size rows from the byte budget."""
    sub = _sublane_multiple(itemsize)
    budget_elems = _BLOCK_BUDGET_BYTES // itemsize

    # Columns: full feature extent whenever a `sub`-row band fits the budget.
    if f <= 128 or sub * f <= budget_elems:
        bn = f
    else:
        bn = max(128, min((budget_elems // sub) // 128 * 128, (f // 128) * 128))

    # Rows: fill the remaining budget, aligned to the dtype sublane packing.
    if b <= sub:
        bm = b  # full extent
    else:
        bm = max(sub, min(b, budget_elems // bn) // sub * sub)

    grid = (pl.cdiv(b, bm), pl.cdiv(f, bn))
    return (b, f), (bm, bn), grid


def flatten_layer(x: jax.Array) -> jax.Array:
    """Pallas equivalent of FlattenLayer.forward: (B, ...) -> (B, prod(...)).

    NOTE: for a truly standalone flatten, `jnp.reshape(x, (B, -1))` alone is
    optimal (metadata only, no HBM traffic).  The pallas_call below is the
    lane-dense identity/fusion-anchor pass requested for this module.
    """
    b = x.shape[0]
    flat = math.prod(x.shape[1:])  # prod(()) == 1 for 1-D inputs, matching .view(B, -1)
    itemsize = jnp.dtype(x.dtype).itemsize
    n = b * flat

    # The actual flatten: a free, layout-only reshape (row-major, same bytes).
    x2 = jnp.reshape(x, (b, flat))

    plan = _plan_slab(n, itemsize)
    if plan is not None:
        slab_shape, block_shape, grid = plan
        x_slab = jnp.reshape(x2, slab_shape)   # free re-view of the same bytes
        index_map = lambda i: (i, 0)
        dim_sem = ("parallel",)
    else:
        slab_shape, block_shape, grid = _plan_bf(b, flat, itemsize)
        x_slab = x2
        index_map = lambda i, j: (i, j)
        dim_sem = ("parallel", "parallel")

    out_slab = pl.pallas_call(
        _copy_kernel,
        out_shape=jax.ShapeDtypeStruct(slab_shape, x.dtype),
        grid=grid,
        in_specs=[pl.BlockSpec(block_shape, index_map)],
        out_specs=pl.BlockSpec(block_shape, index_map),
        compiler_params=pltpu.CompilerParams(
            dimension_semantics=dim_sem,
            vmem_limit_bytes=_VMEM_LIMIT_BYTES,
        ),
        # Pure bandwidth op: tell XLA's scheduler so it can overlap neighbors.
        cost_estimate=pl.CostEstimate(
            flops=0, transcendentals=0, bytes_accessed=2 * n * itemsize),
    )(x_slab)

    return jnp.reshape(out_slab, (b, flat))


if __name__ == "__main__":
    key = jax.random.PRNGKey(0)
    # Small conv-like NCHW input consistent with typical FlattenLayer usage.
    x = jax.random.normal(key, (2, 4, 16, 16), dtype=jnp.float32)

    out = flatten_layer(x)
    out = jax.block_until_ready(out)

    ref = jnp.reshape(x, (x.shape[0], -1))
    assert out.shape == (2, 4 * 16 * 16), out.shape
    assert out.dtype == x.dtype
    assert jnp.array_equal(out, ref), "mismatch vs reference reshape"
    print("KERNEL_OK")
</pallas_src>

<mosaic_0001>
module attributes {stable_mosaic.version = 11 : i64} {
  func.func @_copy_kernel(%arg0: i32, %arg1: memref<1x2048xf32, #tpu.memory_space<vmem>>, %arg2: memref<1x2048xf32, #tpu.memory_space<vmem>>) attributes {dimension_semantics = [#tpu.dimension_semantics<parallel>], iteration_bounds = array<i64: 1>, scalar_prefetch = 0 : i64, scratch_operands = 0 : i64, tpu.core_type = #tpu.core_type<tc>, window_params = [{transform_indices = @transform_0, window_bounds = array<i64: 1, 2048>}, {transform_indices = @transform_1, window_bounds = array<i64: 1, 2048>}]} {
    %c0 = arith.constant 0 : index
    %c0_0 = arith.constant 0 : index
    %0 = vector.load %arg1[%c0, %c0_0] : memref<1x2048xf32, #tpu.memory_space<vmem>>, vector<1x2048xf32>
    %c0_1 = arith.constant 0 : index
    %c0_2 = arith.constant 0 : index
    %1 = vector.load %arg2[%c0_1, %c0_2] : memref<1x2048xf32, #tpu.memory_space<vmem>>, vector<1x2048xf32>
    tpu.vector_store %arg2[%c0_1, %c0_2], %0 {strides = array<i32>} : memref<1x2048xf32, #tpu.memory_space<vmem>>, vector<1x2048xf32>,
    return
  }
  func.func @transform_0(%arg0: i32) -> (i32, i32) {
    %c0_i32 = arith.constant 0 : i32
    %c0_i32_0 = arith.constant 0 : i32
    return %arg0, %c0_i32 : i32, i32
  }
  func.func @transform_1(%arg0: i32) -> (i32, i32) {
    %c0_i32 = arith.constant 0 : i32
    %c0_i32_0 = arith.constant 0 : i32
    return %arg0, %c0_i32 : i32, i32
  }
}

</mosaic_0001>

<bundles_post_ra>
// kernel: tpu_custom_call.1
= control target key start
LH: loop header
LB: loop body
LE: loop exit
PB: predicated region body
PF: predicated region fallthrough
CT: control target
= control target key end

     0   :  { %6 = vsyncpa [#allocation3], 0  ;;  %s126_s0 = inlined_call_operand.hbm [shape: f32[1,2048], index: 0, kind: input, shape index: {}]   ;;  %s127_s1 = inlined_call_operand.hbm [shape: f32[1,2048], index: 1, kind: output, shape index: {}]  }
   0x1   :  { %7 = vsyncpa [#allocation4], 0  ;;  %s90_s6 = smov [#allocation2]   ;;  %s42_s10 = scalar_lea.hbm %s126_s0, 256 }
   0x2   :  { %s14_s7 = sshll.u32 %s90_s6, 4  ;;  %p43_p0 = scmp.ne.s32.totalorder %s126_s0, %s42_s10  ;;  %s15_s7 = int_to_ptr.vmem [resolvable:$true] %s14_s7 }
   0x3   :  { %p46_p1 = scmp.lt.u32.totalorder %s42_s10, %s126_s0 }
   0x5   :  { %p48_p2 = pnand %p46_p1, %p43_p0 }
   0x7   :  { %51 = shalt.err (!%p48_p2)
}
   0x8   :  { %s52_s15 = scalar_lea.vmem %s15_s7, 256  ;;  %p57_p4 = scmp.lt.s32.totalorder %s15_s7, %s15_s7 }
   0x9   :  { %p53_p3 = scmp.ne.s32.totalorder %s15_s7, %s52_s15  ;;  %p58_p5 = scmp.lt.s32.totalorder %s52_s15, %s52_s15 }
   0xb   :  { %p59_p6 = por %p58_p5, %p57_p4 }
   0xd   :  { %p60_p7 = pnand %p59_p6, %p53_p3 }
   0xf   :  { %63 = shalt.err (!%p60_p7)
}
  0x10   :  { %17 = dma.hbm_to_vmem [thread:$0]  %s126_s0, 256, %s15_s7, [#allocation3]  }
  0x11   :  { %86 = dma.done.wait [#allocation3], 256  }
  0x12   :  { %87 = vsyncadd [#allocation3], 4294967040  ;;  %s91_s18 = smov [#allocation5]   ;;  %v21_v0 = vld [vmem:[#allocation2] sm:$0xff]  ;;  %v22_v1 = vld [vmem:[#allocation2 + $0x8] sm:$0xff] }
  0x13   :  { %s31_s19 = sshll.u32 %s91_s18, 4  ;;  %23 = vst [vmem:[#allocation5] sm:$0xff] %v21_v0  ;;  %24 = vst [vmem:[#allocation5 + $0x8] sm:$0xff] %v22_v1  ;;  %s32_s19 = int_to_ptr.vmem [resolvable:$true] %s31_s19 }
  0x14   :  { %s64_s20 = scalar_lea.vmem %s32_s19, 256  ;;  %p69_p9 = scmp.lt.s32.totalorder %s32_s19, %s32_s19 }
  0x15   :  { %p65_p8 = scmp.ne.s32.totalorder %s32_s19, %s64_s20  ;;  %p70_p10 = scmp.lt.s32.totalorder %s64_s20, %s64_s20 }
  0x17   :  { %p71_p11 = por %p70_p10, %p69_p9 }
  0x19   :  { %p72_p12 = pnand %p71_p11, %p65_p8 }
  0x1b   :  { %75 = shalt.err (!%p72_p12)
}
  0x1c   :  { %s76_s0 = scalar_lea.hbm %s127_s1, 256 }
  0x1d   :  { %p77_p13 = scmp.ne.s32.totalorder %s127_s1, %s76_s0  ;;  %p80_p0 = scmp.lt.u32.totalorder %s76_s0, %s127_s1 }
  0x1f   :  { %p82_p1 = pnand %p80_p0, %p77_p13 }
  0x21   :  { %85 = shalt.err (!%p82_p1)
}
  0x22   :  { %34 = dma.vmem_to_hbm [thread:$0]  %s32_s19, 256, %s127_s1, [#allocation4]  }
  0x23   :  { %88 = dma.done.wait [#allocation4], 256  }
  0x24   :  { %89 = vsyncadd [#allocation4], 4294967040 }
  0x25   :  { %38 = vsyncpa [#allocation3], 1 }
  0x26   :  { %39 = vsyncpa [#allocation4], 1 }

</bundles_post_ra>
